<compile_context>
chip_gen: v5e
topology: v5e:2x2
jax: 0.10.0
libtpu: 0.0.40
codegen_flags: <defaults>
</compile_context>

<pallas_src>
import jax
import jax.numpy as jnp
from jax.experimental import pallas as pl
from jax.experimental.pallas import tpu as pltpu

# ---------------- static problem sizes (small, consistent with the module) -------------
B           = 8      # batch size (multiple of 8 -> full f32 sublane tile)
INPUT_DIM   = 48     # cntr feature dim
OUTPUT_DIM  = 32     # -> cntr[:, OUTPUT_DIM:] has width INPUT_DIM - OUTPUT_DIM = 16
ADATA_OUT   = 32     # decoder output dim
LATENT_DIM  = 16
HIDDEN_DIM  = 64
N_NODES     = 12     # number of perturbation nodes in the graph
PEMB_DIM    = 24     # perturbation-embedding dim
BN_EPS      = 1e-5
LEAKY_SLOPE = 0.01   # nn.LeakyReLU default

ENC_W     = 2 * LATENT_DIM               # [mean | log_var] width
OUT_WIDTH = ADATA_OUT + ENC_W            # packed output: [pred | mean | log_var]


def txpert_kernel(cntr_ref, pmat_ref,
                  wbig_ref, bbig_ref,          # fused cntr path: [enc | hidden-pre]
                  wp2h_ref,                    # pert-node -> hidden-pre (BN folded)
                  w2_ref, b2_ref,              # decoder output Linear
                  out_ref):
    f32 = jnp.float32

    # ---- one fused dot: encoder (mean|log_var) + cntr contribution to decoder hidden ----
    # TODO(synk): real VAE class is external; deterministic eval-mode encoder (z = mean).
    y = jnp.dot(cntr_ref[...], wbig_ref[...], preferred_element_type=f32) + bbig_ref[...]
    enc = y[:, :ENC_W]                       # (B, 32) = [mean | log_var]

    # ---- pert_z accumulation loop == multi-hot count matrix @ (z_p @ w1') -------------
    # z_p = adj @ (p_emb @ w_pert) is batch-independent; it and the decoder-layer-1
    # weight are folded in the wrapper, so the whole branch is one (B,12)@(12,64) dot.
    hpre = y[:, ENC_W:] + jnp.dot(pmat_ref[...], wp2h_ref[...], preferred_element_type=f32)

    # ---- decoder: BatchNorm already folded; LeakyReLU; Dropout is identity in eval ----
    h = jnp.where(hpre >= 0.0, hpre, LEAKY_SLOPE * hpre)
    pred = jnp.dot(h, w2_ref[...], preferred_element_type=f32) + b2_ref[...]

    # ---- single lane-dense store: [pred(32) | mean(16) | log_var(16)] -> (B, 64) ----
    out_ref[...] = jnp.concatenate([pred, enc], axis=-1)


def txpert_forward(cntr, pert_count_mat, p_emb, adj, params):
    """Fused TxPert forward. All operands fit in VMEM (full-array blocks, grid-less).

    NOTE(v7x): if the deployment batch grows well beyond 8, add a grid over batch rows
    (block = multiple of 8) with dimension_semantics=("parallel",) to use both TCs; at
    B=8 a grid-less single invocation is strictly cheaper.
    """
    f32 = jnp.float32
    HI = jax.lax.Precision.HIGHEST   # keep trace-time folds numerically tight

    # ---- BatchNorm1d (eval, running stats) folded into decoder layer-1 ----------------
    scale = params["bn_gamma"] * jax.lax.rsqrt(params["bn_var"] + BN_EPS)     # (1, HIDDEN)
    w1af = params["w1a"] * scale                                              # (LAT, HIDDEN)
    w1bf = params["w1b"] * scale                                              # (16, HIDDEN)
    b1f = (params["b1"] - params["bn_mean"]) * scale + params["bn_beta"]      # (1, HIDDEN)

    # ---- encoder fusion: one (INPUT_DIM, 2*LATENT) weight for [mean | log_var] --------
    w_enc = jnp.concatenate([params["w_mu"], params["w_lv"]], axis=1)         # (48, 32)
    b_enc = jnp.concatenate([params["b_mu"], params["b_lv"]], axis=1)         # (1, 32)

    # ---- cntr -> decoder hidden pre-activation, fully folded ---------------------------
    #   h_c = cntr @ (w_mu @ w1af) + cntr[:, OUTPUT_DIM:] @ w1bf + (b_mu @ w1af + b1f)
    w_c2h = jnp.dot(params["w_mu"], w1af, precision=HI)                       # (48, 64)
    w_c2h = w_c2h.at[OUTPUT_DIM:, :].add(w1bf)                                # extra rows
    b_h = jnp.dot(params["b_mu"], w1af, precision=HI) + b1f                   # (1, 64)

    w_big = jnp.concatenate([w_enc, w_c2h], axis=1).astype(f32)               # (48, 96)
    b_big = jnp.concatenate([b_enc, b_h], axis=1).astype(f32)                 # (1, 96)

    # ---- batch-independent graph branch hoisted + folded through decoder layer 1 ------
    # TODO(synk): real GNN class is external; replaced by one dense message-passing step.
    z_p = jnp.dot(adj, jnp.dot(p_emb, params["w_pert"], precision=HI), precision=HI)
    w_p2h = jnp.dot(z_p, w1af, precision=HI).astype(f32)                      # (12, 64)

    inputs = (cntr, pert_count_mat, w_big, b_big, w_p2h, params["w2"], params["b2"])

    vmem = pl.BlockSpec(memory_space=pltpu.MemorySpace.VMEM)
    out = pl.pallas_call(
        txpert_kernel,
        out_shape=jax.ShapeDtypeStruct((B, OUT_WIDTH), f32),
        in_specs=[vmem] * len(inputs),
        out_specs=vmem,
    )(*inputs)

    pred = out[:, :ADATA_OUT]
    mean = out[:, ADATA_OUT:ADATA_OUT + LATENT_DIM]
    log_var = out[:, ADATA_OUT + LATENT_DIM:]
    return pred, mean, log_var


def make_params(key):
    ks = jax.random.split(key, 16)
    nrm = lambda k, shp, s=0.1: (s * jax.random.normal(k, shp)).astype(jnp.float32)
    return {
        "w_pert": nrm(ks[0], (PEMB_DIM, LATENT_DIM)),
        "w_mu":  nrm(ks[1], (INPUT_DIM, LATENT_DIM)),
        "b_mu":  nrm(ks[2], (1, LATENT_DIM)),
        "w_lv":  nrm(ks[3], (INPUT_DIM, LATENT_DIM)),
        "b_lv":  nrm(ks[4], (1, LATENT_DIM)),
        "w1a":   nrm(ks[5], (LATENT_DIM, HIDDEN_DIM)),
        "w1b":   nrm(ks[6], (INPUT_DIM - OUTPUT_DIM, HIDDEN_DIM)),
        "b1":    nrm(ks[7], (1, HIDDEN_DIM)),
        "bn_gamma": (1.0 + nrm(ks[8], (1, HIDDEN_DIM))),
        "bn_beta":  nrm(ks[9], (1, HIDDEN_DIM)),
        "bn_mean":  nrm(ks[10], (1, HIDDEN_DIM)),
        "bn_var":   (1.0 + 0.1 * jax.random.uniform(ks[11], (1, HIDDEN_DIM))).astype(jnp.float32),
        "w2":    nrm(ks[12], (HIDDEN_DIM, ADATA_OUT)),
        "b2":    nrm(ks[13], (1, ADATA_OUT)),
    }


def reference_forward(cntr, pmat, p_emb, adj, p):
    """Unfused plain-JAX reference matching the original (eval-mode) module math."""
    mean = cntr @ p["w_mu"] + p["b_mu"]
    log_var = cntr @ p["w_lv"] + p["b_lv"]
    z_p = adj @ (p_emb @ p["w_pert"])
    pert_z = pmat @ z_p
    lat = mean + pert_z
    extra = cntr[:, OUTPUT_DIM:]
    h = lat @ p["w1a"] + extra @ p["w1b"] + p["b1"]
    h = (h - p["bn_mean"]) / jnp.sqrt(p["bn_var"] + BN_EPS) * p["bn_gamma"] + p["bn_beta"]
    h = jnp.where(h >= 0.0, h, LEAKY_SLOPE * h)
    pred = h @ p["w2"] + p["b2"]
    return pred, mean, log_var


if __name__ == "__main__":
    key = jax.random.PRNGKey(0)
    k_cntr, k_emb, k_adj, k_pert, k_par = jax.random.split(key, 5)

    cntr = jax.random.normal(k_cntr, (B, INPUT_DIM), dtype=jnp.float32)
    p_emb = jax.random.normal(k_emb, (N_NODES, PEMB_DIM), dtype=jnp.float32)
    # dense symmetric adjacency stand-in (edge_index/edge_weight densified in glue)
    adj_raw = jax.random.uniform(k_adj, (N_NODES, N_NODES))
    sym = 0.5 * (adj_raw + adj_raw.T)
    adj = (sym * (sym > 0.55)).astype(jnp.float32)          # symmetric mask of symmetric weights

    # pert_idxs: per-sample list of perturbation node ids -> multi-hot count matrix
    pert_ids = jax.random.randint(k_pert, (B, 2), 0, N_NODES)           # 2 perts / sample
    pert_count_mat = jnp.zeros((B, N_NODES), jnp.float32)
    pert_count_mat = pert_count_mat.at[jnp.arange(B)[:, None], pert_ids].add(1.0)

    params = make_params(k_par)

    pred, mean, log_var = jax.jit(txpert_forward)(cntr, pert_count_mat, p_emb, adj, params)
    jax.block_until_ready((pred, mean, log_var))

    # correctness check against plain-JAX reference
    r_pred, r_mean, r_lv = reference_forward(cntr, pert_count_mat, p_emb, adj, params)
    assert pred.shape == (B, ADATA_OUT) and mean.shape == (B, LATENT_DIM)
    assert log_var.shape == (B, LATENT_DIM)
    # pred path has weights algebraically refolded (associativity differs) -> 2e-4 tol
    assert jnp.allclose(pred, r_pred, atol=2e-4, rtol=2e-4)
    assert jnp.allclose(mean, r_mean, atol=1e-5, rtol=1e-5)
    assert jnp.allclose(log_var, r_lv, atol=1e-5, rtol=1e-5)

    print("KERNEL_OK")
</pallas_src>

<mosaic_0001>
module attributes {stable_mosaic.version = 11 : i64} {
  func.func @txpert_kernel(%arg0: memref<8x48xf32, #tpu.memory_space<vmem>>, %arg1: memref<8x12xf32, #tpu.memory_space<vmem>>, %arg2: memref<48x96xf32, #tpu.memory_space<vmem>>, %arg3: memref<1x96xf32, #tpu.memory_space<vmem>>, %arg4: memref<12x64xf32, #tpu.memory_space<vmem>>, %arg5: memref<64x32xf32, #tpu.memory_space<vmem>>, %arg6: memref<1x32xf32, #tpu.memory_space<vmem>>, %arg7: memref<8x64xf32, #tpu.memory_space<vmem>>) attributes {dimension_semantics = [], scalar_prefetch = 0 : i64, scratch_operands = 0 : i64, tpu.core_type = #tpu.core_type<tc>} {
    %c0 = arith.constant 0 : index
    %c0_0 = arith.constant 0 : index
    %0 = vector.load %arg0[%c0, %c0_0] : memref<8x48xf32, #tpu.memory_space<vmem>>, vector<8x48xf32>
    %c0_1 = arith.constant 0 : index
    %c0_2 = arith.constant 0 : index
    %1 = vector.load %arg2[%c0_1, %c0_2] : memref<48x96xf32, #tpu.memory_space<vmem>>, vector<48x96xf32>
    %cst = arith.constant dense<0.000000e+00> : vector<8x96xf32>
    %2 = tpu.matmul %0, %1, %cst {dimension_numbers = #tpu.dot_dimension_numbers<[1], [0], [0], [1], [0, 0, 1, 1], [], []>} : vector<8x48xf32>, vector<48x96xf32>, vector<8x96xf32> -> vector<8x96xf32>
    %c0_3 = arith.constant 0 : index
    %c0_4 = arith.constant 0 : index
    %3 = vector.load %arg3[%c0_3, %c0_4] : memref<1x96xf32, #tpu.memory_space<vmem>>, vector<1x96xf32>
    %4 = vector.broadcast %3 : vector<1x96xf32> to vector<8x96xf32>
    %5 = arith.addf %2, %4 : vector<8x96xf32>
    %6 = vector.extract_strided_slice %5 {offsets = [0, 0], sizes = [8, 32], strides = [1, 1]} : vector<8x96xf32> to vector<8x32xf32>
    %7 = vector.extract_strided_slice %5 {offsets = [0, 32], sizes = [8, 64], strides = [1, 1]} : vector<8x96xf32> to vector<8x64xf32>
    %c0_5 = arith.constant 0 : index
    %c0_6 = arith.constant 0 : index
    %8 = vector.load %arg1[%c0_5, %c0_6] : memref<8x12xf32, #tpu.memory_space<vmem>>, vector<8x12xf32>
    %c0_7 = arith.constant 0 : index
    %c0_8 = arith.constant 0 : index
    %9 = vector.load %arg4[%c0_7, %c0_8] : memref<12x64xf32, #tpu.memory_space<vmem>>, vector<12x64xf32>
    %cst_9 = arith.constant dense<0.000000e+00> : vector<8x64xf32>
    %10 = tpu.matmul %8, %9, %cst_9 {dimension_numbers = #tpu.dot_dimension_numbers<[1], [0], [0], [1], [0, 0, 1, 1], [], []>} : vector<8x12xf32>, vector<12x64xf32>, vector<8x64xf32> -> vector<8x64xf32>
    %11 = arith.addf %7, %10 : vector<8x64xf32>
    %cst_10 = arith.constant 0.000000e+00 : f32
    %12 = vector.broadcast %cst_10 : f32 to vector<8x64xf32>
    %13 = arith.cmpf oge, %11, %12 : vector<8x64xf32>
    %cst_11 = arith.constant 0.00999999977 : f32
    %14 = vector.broadcast %cst_11 : f32 to vector<8x64xf32>
    %15 = arith.mulf %14, %11 : vector<8x64xf32>
    %16 = arith.select %13, %11, %15 : vector<8x64xi1>, vector<8x64xf32>
    %c0_12 = arith.constant 0 : index
    %c0_13 = arith.constant 0 : index
    %17 = vector.load %arg5[%c0_12, %c0_13] : memref<64x32xf32, #tpu.memory_space<vmem>>, vector<64x32xf32>
    %cst_14 = arith.constant dense<0.000000e+00> : vector<8x32xf32>
    %18 = tpu.matmul %16, %17, %cst_14 {dimension_numbers = #tpu.dot_dimension_numbers<[1], [0], [0], [1], [0, 0, 1, 1], [], []>} : vector<8x64xf32>, vector<64x32xf32>, vector<8x32xf32> -> vector<8x32xf32>
    %c0_15 = arith.constant 0 : index
    %c0_16 = arith.constant 0 : index
    %19 = vector.load %arg6[%c0_15, %c0_16] : memref<1x32xf32, #tpu.memory_space<vmem>>, vector<1x32xf32>
    %20 = vector.broadcast %19 : vector<1x32xf32> to vector<8x32xf32>
    %21 = arith.addf %18, %20 : vector<8x32xf32>
    %22 = tpu.concatenate %21, %6 in 1 : vector<8x32xf32>, vector<8x32xf32> -> vector<8x64xf32>
    %c0_17 = arith.constant 0 : index
    %c0_18 = arith.constant 0 : index
    %23 = vector.load %arg7[%c0_17, %c0_18] : memref<8x64xf32, #tpu.memory_space<vmem>>, vector<8x64xf32>
    tpu.vector_store %arg7[%c0_17, %c0_18], %22 {strides = array<i32>} : memref<8x64xf32, #tpu.memory_space<vmem>>, vector<8x64xf32>,
    return
  }
}

</mosaic_0001>

<bundles_post_ra>
// kernel: txpert_forward.1
= control target key start
LH: loop header
LB: loop body
LE: loop exit
PB: predicated region body
PF: predicated region fallthrough
CT: control target
= control target key end

     0   :  { %vm68_vm0 = vcmask 1043456   ;;  %vm64_vm1 = vcmask 97280   ;;  %vm37_vm2 = vcmask 392192   ;;  %s157_s19 = smov 32   ;;  %s158_s12 = smov 96   ;;  %vm115_vm4 = vcmask 523264   ;;  %s262_s4 = inlined_call_operand.vmem [shape: f32[12,64], index: 4, kind: input, shape index: {}]   ;;  %s263_s1 = inlined_call_operand.vmem [shape: f32[8,12], index: 1, kind: input, shape index: {}]   ;;  %s264_s2 = inlined_call_operand.vmem [shape: f32[48,96], index: 2, kind: input, shape index: {}]   ;;  %s265_s3 = inlined_call_operand.vmem [shape: f32[1,96], index: 3, kind: input, shape index: {}]   ;;  %s266_s0 = inlined_call_operand.vmem [shape: f32[8,48], index: 0, kind: input, shape index: {}]   ;;  %s267_s5 = inlined_call_operand.vmem [shape: f32[64,32], index: 5, kind: input, shape index: {}]   ;;  %s268_s6 = inlined_call_operand.vmem [shape: f32[1,32], index: 6, kind: input, shape index: {}]   ;;  %s269_s7 = inlined_call_operand.vmem [shape: f32[8,64], index: 7, kind: output, shape index: {}]  }
   0x1   :  { %v63_v0 = vld [vmem:[%s262_s4 + $0x8] sm:$0xf]  ;;  %v62_v1 = vld [vmem:[%s262_s4] sm:$0xff]  ;;  %v30_v5 = vld [vmem:[%s264_s2 + $0x18] sm:$0xff]  ;;  %vm142_vm5 = vcmask 261120  }
   0x2   :  { %150 = vmatpush.msk.msra.mxu1 %vm68_vm0, %v63_v0  ;;  %v61_v2 = vld [vmem:[%s263_s1] sm:$0xff]  ;;  %v32_v3 = vld [vmem:[%s264_s2 + $0x28] sm:$0xff]  ;;  %v29_v6 = vld [vmem:[%s264_s2 + $0x10] sm:$0xff] }
   0x3   :  { %v31_v4 = vld [vmem:[%s264_s2 + $0x20] sm:$0xff]  ;;  %51 = vmatpush.msra.mxu0 %v32_v3  ;;  %v28_v7 = vld [vmem:[%s264_s2 + $0x8] sm:$0xff]  ;;  %v107_v14 = vld [vmem:[%s267_s5 + $0x38] sm:$0xff] }
   0x4   :  { %87 = vmatpush.msra.mxu1 %v62_v1  ;;  %v27_v8 = vld [vmem:[%s264_s2] sm:$0xff]  ;;  %v106_v15 = vld [vmem:[%s267_s5 + $0x30] sm:$0xff]  ;;  %126 = vmatpush.msra.mxu2 %v107_v14  ;;  %v105_v16 = vld [vmem:[%s267_s5 + $0x28] sm:$0xff] }
   0x5   :  { %151 = vmatmul.msk.f32.vlgmr.msra.gmra.mxu1 %vm64_vm1, %v61_v2  ;;  %52 = vmatpush.msra.mxu0 %v31_v4  ;;  %v26_v9 = vld [vmem:[%s266_s0] sm:$0xff]  ;;  %v103_v18 = vld [vmem:[%s267_s5 + $0x18] sm:$0xff]  ;;  %v102_v19 = vld [vmem:[%s267_s5 + $0x10] sm:$0xff] }
   0x6   :  { %v155_v11 = vld [vmem:[%s265_s3] ss:$0 sm:$0xff]  ;;  %127 = vmatpush.msra.mxu2 %v106_v15  ;;  %v101_v20 = vld [vmem:[%s267_s5 + $0x8] sm:$0xff] }
   0x7   :  { %53 = vmatpush.msra.mxu0 %v30_v5  ;;  %v104_v17 = vld [vmem:[%s267_s5 + $0x20] sm:$0xff] }
   0x8   :  { %128 = vmatpush.msra.mxu2 %v105_v16  ;;  %v100_v21 = vld [vmem:[%s267_s5] sm:$0xff] }
   0x9   :  { %54 = vmatpush.msra.mxu0 %v29_v6  ;;  %v156_v27 = vld [vmem:[%s268_s6] ss:$0 sm:$0xff] }
   0xa   :  { %129 = vmatpush.msra.mxu2 %v104_v17 }
   0xb   :  { %55 = vmatpush.msra.mxu0 %v28_v7 }
   0xc   :  { %130 = vmatpush.msra.mxu2 %v103_v18 }
   0xd   :  { %56 = vmatpush.msra.mxu0 %v27_v8 }
   0xe   :  { %149 = vmatmul.msk.f32.vlgmr.msra.gmra.mxu0 %vm37_vm2, %v26_v9  ;;  %131 = vmatpush.msra.mxu2 %v102_v19 }
  0x10   :  { %132 = vmatpush.msra.mxu2 %v101_v20 }
  0x12   :  { %133 = vmatpush.msra.mxu2 %v100_v21 }
  0x82   :  { %v89_v10 = vpop.f32.mrf.mxu1 }
  0x83   :  { %93 = vrot.lane.b32.xlu0 %v89_v10, %s157_s19 }
  0x8b   :  { %v58_v12 = vpop.f32.mrf.mxu0 }
  0x8c   :  { %v59_v13 = vadd.f32 %v155_v11, %v58_v12 }
  0x8e   :  { %139 = vrot.lane.b32.xlu1 %v59_v13, %s157_s19 }
  0xf5   :  { %v94_v22 = vpop.permute.xlu0 %93 }
  0xf6   :  { %v96_v23 = vadd.f32 %v94_v22, %v59_v13 }
  0xf8   :  { %v98_v24 = vmul.f32 0.01, %v96_v23  ;;  %vm97_vm3 = vcmp.ge.f32.partialorder %v96_v23, 0.0 }
  0xfa   :  { %v99_v25 = vsel %vm97_vm3, %v96_v23, %v98_v24 }
  0xfb   :  { %113 = vrot.lane.b32.xlu0 %v99_v25, %s158_s12 }
 0x100   :  { %v140_v30 = vpop.permute.xlu1 %139 }
 0x16d   :  { %v114_v26 = vpop.permute.xlu0 %113 }
 0x16e   :  { %152 = vmatmul.msk.f32.vlgmr.msra.gmra.mxu2 %vm115_vm4, %v114_v26 }
 0x1f1   :  { %v135_v28 = vpop.f32.mrf.mxu2 }
 0x1f2   :  { %v136_v29 = vadd.f32 %v156_v27, %v135_v28 }
 0x1f4   :  { %v143_v31 = vsel %vm142_vm5, %v136_v29, %v140_v30 }
 0x1f5   :  { %144 = vst.msk [vmem:[%s269_s7] sm:$0xff] %vm115_vm4, %v143_v31 }

</bundles_post_ra>
